<compile_context>
chip_gen: v7x
topology: tpu7x:2x2x1
jax: 0.10.0
libtpu: 0.0.40
codegen_flags: <defaults>
</compile_context>

<pallas_src>
import jax
import jax.numpy as jnp
from jax.experimental import pallas as pl
from jax.experimental.pallas import tpu as pltpu


def _cls_head_kernel(x_ref, w1_ref, b1_ref, w2_ref, b2_ref, out_ref):
    # x_ref  : [TB, H]   CLS features tile (native dtype)
    # w1_ref : [H, H]    dense weight, stored so that y = x @ W1 + b1
    # b1_ref : [1, H]
    # w2_ref : [H, Lp]   out_proj weight (label dim padded to lane-dense Lp)
    # b2_ref : [1, Lp]
    # out_ref: [TB, Lp]
    x = x_ref[...]

    # dense -> tanh: MXU gets the native dtype, accumulates in f32;
    # bias add + tanh epilogue stays in f32.
    h = jnp.dot(x, w1_ref[...], preferred_element_type=jnp.float32)
    h = jnp.tanh(h + b1_ref[...].astype(jnp.float32))

    # out_proj
    o = jnp.dot(h.astype(w2_ref.dtype), w2_ref[...],
                preferred_element_type=jnp.float32)
    o = o + b2_ref[...].astype(jnp.float32)

    out_ref[...] = o.astype(out_ref.dtype)


def roberta_classification_head(features, w_dense, b_dense, w_out, b_out,
                                *, batch_tile=256):
    """features: [B, S, H]. Linear weights stored pre-transposed (y = x @ W + b).

    Returns logits [B, L].
    """
    B, S, H = features.shape
    L = w_out.shape[1]
    out_dtype = features.dtype

    # --- lane-dense label padding (L -> Lp, multiple of 128) ----------------
    Lp = ((L + 127) // 128) * 128
    pad_l = Lp - L
    w_out_p = jnp.pad(w_out, ((0, 0), (0, pad_l))) if pad_l else w_out
    b_out_p = jnp.pad(b_out, ((0, pad_l),)) if pad_l else b_out
    b1 = b_dense.reshape(1, H)
    b2 = b_out_p.reshape(1, Lp)

    # --- batch tiling over the grid -----------------------------------------
    TB = B if B <= batch_tile else batch_tile   # TB == B (full) or 256 (mult of 8)
    grid = (pl.cdiv(B, TB),)

    # --- CLS slice fused into the BlockSpec ---------------------------------
    # [B, S, H] -> [B, S*H] is a free (contiguous) reshape; the x BlockSpec
    # then DMAs only columns [0:H] of each row, i.e. exactly features[:, 0, :].
    if (H % 128 == 0) or (S == 1):
        x_in = features.reshape(B, S * H)
    else:
        # Fallback: lane dim H would violate the (8,128) block constraint on
        # the [B, S*H] view, so do the slice in the wrapper instead.
        x_in = features[:, 0, :]
    x_spec = pl.BlockSpec((TB, H), lambda i: (i, 0))

    itemsize = jnp.dtype(out_dtype).itemsize
    cost = pl.CostEstimate(
        flops=2 * B * H * H + 2 * B * H * Lp,
        transcendentals=B * H,
        bytes_accessed=int(
            B * H * itemsize
            + w_dense.size * jnp.dtype(w_dense.dtype).itemsize
            + b1.size * jnp.dtype(b1.dtype).itemsize
            + w_out_p.size * jnp.dtype(w_out_p.dtype).itemsize
            + b2.size * jnp.dtype(b2.dtype).itemsize
            + B * Lp * itemsize),
    )

    out = pl.pallas_call(
        _cls_head_kernel,
        out_shape=jax.ShapeDtypeStruct((B, Lp), out_dtype),
        grid_spec=pl.GridSpec(
            grid=grid,
            in_specs=[
                x_spec,                                   # [TB, H] per grid step
                pl.BlockSpec((H, H), lambda i: (0, 0)),   # resident across grid
                pl.BlockSpec((1, H), lambda i: (0, 0)),   # resident
                pl.BlockSpec((H, Lp), lambda i: (0, 0)),  # resident
                pl.BlockSpec((1, Lp), lambda i: (0, 0)),  # resident
            ],
            out_specs=pl.BlockSpec((TB, Lp), lambda i: (i, 0)),
        ),
        compiler_params=pltpu.CompilerParams(
            dimension_semantics=("parallel",)),           # 2x on v7x dual-TC
        cost_estimate=cost,
    )(x_in, w_dense, b1, w_out_p, b2)

    return out[:, :L] if pad_l else out


def _reference(features, w_dense, b_dense, w_out, b_out):
    hp = jax.lax.Precision.HIGHEST
    x = features[:, 0, :]
    x = jnp.tanh(jnp.dot(x, w_dense, precision=hp) + b_dense)
    return jnp.dot(x, w_out, precision=hp) + b_out


if __name__ == "__main__":
    # Small shapes consistent with the module: batch=2, seq=8, hidden=128,
    # num_labels=4 (hidden chosen lane-aligned; real RoBERTa uses 768/1024).
    B, S, H, L = 2, 8, 128, 4

    key = jax.random.PRNGKey(0)
    k_feat, k_w1, k_b1, k_w2, k_b2 = jax.random.split(key, 5)

    features = jax.random.normal(k_feat, (B, S, H), dtype=jnp.float32)
    # nn.Linear weights, stored pre-transposed so y = x @ W + b.
    w_dense = jax.random.normal(k_w1, (H, H), dtype=jnp.float32) * 0.05
    b_dense = jax.random.normal(k_b1, (H,), dtype=jnp.float32) * 0.05
    w_out = jax.random.normal(k_w2, (H, L), dtype=jnp.float32) * 0.05
    b_out = jax.random.normal(k_b2, (L,), dtype=jnp.float32) * 0.05

    logits = roberta_classification_head(features, w_dense, b_dense,
                                         w_out, b_out)
    logits = jax.block_until_ready(logits)

    ref = _reference(features, w_dense, b_dense, w_out, b_out)
    assert logits.shape == (B, L)
    assert jnp.allclose(logits, ref, atol=1e-4, rtol=1e-4), "mismatch vs reference"

    print("KERNEL_OK")
</pallas_src>

<mosaic_0001>
module attributes {stable_mosaic.version = 11 : i64} {
  func.func @_cls_head_kernel(%arg0: i32, %arg1: memref<2x128xf32, #tpu.memory_space<vmem>>, %arg2: memref<128x128xf32, #tpu.memory_space<vmem>>, %arg3: memref<1x128xf32, #tpu.memory_space<vmem>>, %arg4: memref<128x128xf32, #tpu.memory_space<vmem>>, %arg5: memref<1x128xf32, #tpu.memory_space<vmem>>, %arg6: memref<2x128xf32, #tpu.memory_space<vmem>>) attributes {dimension_semantics = [#tpu.dimension_semantics<parallel>], iteration_bounds = array<i64: 1>, scalar_prefetch = 0 : i64, scratch_operands = 0 : i64, tpu.core_type = #tpu.core_type<tc>, window_params = [{transform_indices = @transform_0, window_bounds = array<i64: 2, 128>}, {pipeline_mode = #tpu.pipeline_mode<synchronous>, transform_indices = @transform_1, window_bounds = array<i64: 128, 128>}, {pipeline_mode = #tpu.pipeline_mode<synchronous>, transform_indices = @transform_2, window_bounds = array<i64: 1, 128>}, {pipeline_mode = #tpu.pipeline_mode<synchronous>, transform_indices = @transform_3, window_bounds = array<i64: 128, 128>}, {pipeline_mode = #tpu.pipeline_mode<synchronous>, transform_indices = @transform_4, window_bounds = array<i64: 1, 128>}, {transform_indices = @transform_5, window_bounds = array<i64: 2, 128>}]} {
    %c0 = arith.constant 0 : index
    %c0_0 = arith.constant 0 : index
    %0 = vector.load %arg1[%c0, %c0_0] : memref<2x128xf32, #tpu.memory_space<vmem>>, vector<2x128xf32>
    %c0_1 = arith.constant 0 : index
    %c0_2 = arith.constant 0 : index
    %1 = vector.load %arg2[%c0_1, %c0_2] : memref<128x128xf32, #tpu.memory_space<vmem>>, vector<128x128xf32>
    %cst = arith.constant dense<0.000000e+00> : vector<2x128xf32>
    %2 = tpu.matmul %0, %1, %cst {dimension_numbers = #tpu.dot_dimension_numbers<[1], [0], [0], [1], [0, 0, 1, 1], [], []>} : vector<2x128xf32>, vector<128x128xf32>, vector<2x128xf32> -> vector<2x128xf32>
    %c0_3 = arith.constant 0 : index
    %c0_4 = arith.constant 0 : index
    %3 = vector.load %arg3[%c0_3, %c0_4] : memref<1x128xf32, #tpu.memory_space<vmem>>, vector<1x128xf32>
    %4 = vector.broadcast %3 : vector<1x128xf32> to vector<2x128xf32>
    %5 = arith.addf %2, %4 : vector<2x128xf32>
    %6 = math.tanh %5 : vector<2x128xf32>
    %c0_5 = arith.constant 0 : index
    %c0_6 = arith.constant 0 : index
    %7 = vector.load %arg4[%c0_5, %c0_6] : memref<128x128xf32, #tpu.memory_space<vmem>>, vector<128x128xf32>
    %cst_7 = arith.constant dense<0.000000e+00> : vector<2x128xf32>
    %8 = tpu.matmul %6, %7, %cst_7 {dimension_numbers = #tpu.dot_dimension_numbers<[1], [0], [0], [1], [0, 0, 1, 1], [], []>} : vector<2x128xf32>, vector<128x128xf32>, vector<2x128xf32> -> vector<2x128xf32>
    %c0_8 = arith.constant 0 : index
    %c0_9 = arith.constant 0 : index
    %9 = vector.load %arg5[%c0_8, %c0_9] : memref<1x128xf32, #tpu.memory_space<vmem>>, vector<1x128xf32>
    %10 = vector.broadcast %9 : vector<1x128xf32> to vector<2x128xf32>
    %11 = arith.addf %8, %10 : vector<2x128xf32>
    %c0_10 = arith.constant 0 : index
    %c0_11 = arith.constant 0 : index
    %12 = vector.load %arg6[%c0_10, %c0_11] : memref<2x128xf32, #tpu.memory_space<vmem>>, vector<2x128xf32>
    tpu.vector_store %arg6[%c0_10, %c0_11], %11 {strides = array<i32>} : memref<2x128xf32, #tpu.memory_space<vmem>>, vector<2x128xf32>,
    return
  }
  func.func @transform_0(%arg0: i32) -> (i32, i32) {
    %c0_i32 = arith.constant 0 : i32
    %c0_i32_0 = arith.constant 0 : i32
    return %arg0, %c0_i32 : i32, i32
  }
  func.func @transform_1(%arg0: i32) -> (i32, i32) {
    %c0_i32 = arith.constant 0 : i32
    %c0_i32_0 = arith.constant 0 : i32
    %c0_i32_1 = arith.constant 0 : i32
    return %c0_i32, %c0_i32_0 : i32, i32
  }
  func.func @transform_2(%arg0: i32) -> (i32, i32) {
    %c0_i32 = arith.constant 0 : i32
    %c0_i32_0 = arith.constant 0 : i32
    %c0_i32_1 = arith.constant 0 : i32
    return %c0_i32, %c0_i32_0 : i32, i32
  }
  func.func @transform_3(%arg0: i32) -> (i32, i32) {
    %c0_i32 = arith.constant 0 : i32
    %c0_i32_0 = arith.constant 0 : i32
    %c0_i32_1 = arith.constant 0 : i32
    return %c0_i32, %c0_i32_0 : i32, i32
  }
  func.func @transform_4(%arg0: i32) -> (i32, i32) {
    %c0_i32 = arith.constant 0 : i32
    %c0_i32_0 = arith.constant 0 : i32
    %c0_i32_1 = arith.constant 0 : i32
    return %c0_i32, %c0_i32_0 : i32, i32
  }
  func.func @transform_5(%arg0: i32) -> (i32, i32) {
    %c0_i32 = arith.constant 0 : i32
    %c0_i32_0 = arith.constant 0 : i32
    return %arg0, %c0_i32 : i32, i32
  }
}

</mosaic_0001>

<bundles_post_ra>
// kernel: tpu_custom_call.1
= control target key start
LH: loop header
LB: loop body
LE: loop exit
PB: predicated region body
PF: predicated region fallthrough
CT: control target
= control target key end

     0   :  { %10 = vsyncpa [#allocation3], 0  ;;  %s642_s0 = inlined_call_operand.hbm [shape: f32[2,1024], index: 0, kind: input, shape index: {}]   ;;  %s643_s1 = inlined_call_operand.hbm [shape: f32[128,128], index: 1, kind: input, shape index: {}]   ;;  %s644_s2 = inlined_call_operand.vmem [shape: f32[1,128], index: 2, kind: input, shape index: {}]   ;;  %s645_s3 = inlined_call_operand.hbm [shape: f32[128,128], index: 3, kind: input, shape index: {}]   ;;  %s646_s4 = inlined_call_operand.vmem [shape: f32[1,128], index: 4, kind: input, shape index: {}]   ;;  %s647_s5 = inlined_call_operand.hbm [shape: f32[2,128], index: 5, kind: output, shape index: {}]  }
   0x1   :  { %11 = vsyncpa [#allocation6], 0 }
   0x2   :  { %12 = vsyncpa [#allocation4], 0  ;;  %s524_s18 = smov [#allocation5]   ;;  %s430_s22 = scalar_lea.hbm %s643_s1, 2048 }
   0x3   :  { %s28_s19 = sshll.u32 %s524_s18, 4  ;;  %p431_p0 = scmp.ne.s32.totalorder %s643_s1, %s430_s22  ;;  %s29_s19 = int_to_ptr.vmem [resolvable:$true] %s28_s19 }
   0x4   :  { %p434_p1 = scmp.lt.u32.totalorder %s430_s22, %s643_s1 }
   0x6   :  { %p436_p2 = pnand %p434_p1, %p431_p0 }
   0x8   :  { %439 = shalt.err (!%p436_p2)
}
   0x9   :  { %s440_s27 = scalar_lea.vmem %s29_s19, 2048  ;;  %p445_p4 = scmp.lt.s32.totalorder %s29_s19, %s29_s19 }
   0xa   :  { %p441_p3 = scmp.ne.s32.totalorder %s29_s19, %s440_s27  ;;  %p446_p5 = scmp.lt.s32.totalorder %s440_s27, %s440_s27 }
   0xc   :  { %p447_p6 = por %p446_p5, %p445_p4 }
   0xe   :  { %p448_p7 = pnand %p447_p6, %p441_p3 }
  0x10   :  { %451 = shalt.err (!%p448_p7)
}
  0x11   :  { %s525_s28 = smov 128   ;;  %s526_s29 = smov 8  }
  0x12   :  { %34 = dma.hbm_to_vmem [thread:$0]  %s643_s1, 2048, %s29_s19, [#allocation6], %s525_s28, %s525_s28, %s526_s29  }
  0x13   :  { %s527_s7 = smov [#allocation2]   ;;  %s528_s9 = smov [#allocation7]  }
  0x14   :  { %s19_s8 = sshll.u32 %s527_s7, 4  ;;  %s42_s10 = sshll.u32 %s528_s9, 4  ;;  %s20_s8 = int_to_ptr.vmem [resolvable:$true] %s19_s8  ;;  %s43_s10 = int_to_ptr.vmem [resolvable:$true] %s42_s10 }
  0x15   :  { %s452_s13 = scalar_lea.hbm %s642_s0, 32  ;;  %s454_s18 = scalar_lea.hbm %s642_s0, 256 }
  0x16   :  { %p453_p8 = scmp.ne.s32.totalorder %s642_s0, %s452_s13  ;;  %p455_p9 = scmp.lt.u32.totalorder %s454_s18, %s452_s13 }
  0x17   :  { %p456_p10 = scmp.lt.u32.totalorder %s452_s13, %s642_s0 }
  0x19   :  { %p457_p11 = por %p456_p10, %p455_p9 }
  0x1b   :  { %p458_p12 = pnand %p457_p11, %p453_p8 }
  0x1d   :  { %461 = shalt.err (!%p458_p12)
}
  0x1e   :  { %s462_s19 = scalar_lea.vmem %s20_s8, 32  ;;  %p467_p0 = scmp.lt.s32.totalorder %s20_s8, %s20_s8 }
  0x1f   :  { %p463_p13 = scmp.ne.s32.totalorder %s20_s8, %s462_s19  ;;  %p468_p1 = scmp.lt.s32.totalorder %s462_s19, %s462_s19 }
  0x21   :  { %p469_p2 = por %p468_p1, %p467_p0 }
  0x23   :  { %p470_p3 = pnand %p469_p2, %p463_p13 }
  0x25   :  { %473 = shalt.err (!%p470_p3)
}
  0x26   :  { %22 = dma.hbm_to_vmem [thread:$0]  %s642_s0, 32, %s20_s8, [#allocation3]  }
  0x27   :  { %s474_s25 = scalar_lea.hbm %s645_s3, 2048 }
  0x28   :  { %p475_p4 = scmp.ne.s32.totalorder %s645_s3, %s474_s25  ;;  %p478_p5 = scmp.lt.u32.totalorder %s474_s25, %s645_s3 }
  0x2a   :  { %p480_p6 = pnand %p478_p5, %p475_p4 }
  0x2c   :  { %483 = shalt.err (!%p480_p6)
}
  0x2d   :  { %s484_s7 = scalar_lea.vmem %s43_s10, 2048  ;;  %p489_p8 = scmp.lt.s32.totalorder %s43_s10, %s43_s10 }
  0x2e   :  { %p485_p7 = scmp.ne.s32.totalorder %s43_s10, %s484_s7  ;;  %p490_p9 = scmp.lt.s32.totalorder %s484_s7, %s484_s7 }
  0x30   :  { %p491_p10 = por %p490_p9, %p489_p8 }
  0x32   :  { %p492_p11 = pnand %p491_p10, %p485_p7 }
  0x34   :  { %495 = shalt.err (!%p492_p11)
}
  0x35   :  { %48 = dma.hbm_to_vmem [thread:$0]  %s645_s3, 2048, %s43_s10, [#allocation6], %s525_s28, %s525_s28, %s526_s29  }
  0x36   :  { %518 = dma.done.wait [#allocation3], 32  }
  0x37   :  { %519 = vsyncadd [#allocation3], 4294967264 }
  0x38   :  { %520 = dma.done.wait [#allocation6], 4096  }
  0x39   :  { %521 = vsyncadd [#allocation6], 4294963200  ;;  %v529_v0 = vmov 0.0|0.0   ;;  %vm530_vm0 = vmmov 0   ;;  %v531_v1 = vmov 0.0   ;;  %v61_v2 = vld [vmem:[#allocation5] sm:$0xff] }
  0x3a   :  { %371 = vmatprep.subr.bf16.mxu0 %v529_v0  ;;  %333 = vmatprep.mubr.msk.f32.mxu0 %vm530_vm0, %v531_v1  ;;  %v62_v3 = vld [vmem:[#allocation5 + $0x8] sm:$0xff]  ;;  %v63_v4 = vld [vmem:[#allocation5 + $0x10] sm:$0xff]  ;;  %v64_v6 = vld [vmem:[#allocation5 + $0x18] sm:$0xff]  ;;  %s532_s10 = smov [#allocation8]  }
  0x3b   :  { %395 = vmatprep.subr.bf16.mxu1 %v529_v0  ;;  %368 = vmatprep.mubr.msk.f32.mxu1 %vm530_vm0, %v531_v1  ;;  %v372_v5 = vpack.c.bf16 %v62_v3, %v61_v2  ;;  %v375_v7 = vpack.c.bf16 %v64_v6, %v63_v4  ;;  %v65_v8 = vld [vmem:[#allocation5 + $0x20] sm:$0xff]  ;;  %v66_v9 = vld [vmem:[#allocation5 + $0x28] sm:$0xff]  ;;  %v157_v12 = vld [vmem:[#allocation7 + $0x10] sm:$0xff]  ;;  %s255_s11 = sshll.u32 %s532_s10, 4  ;;  %s256_s11 = int_to_ptr.vmem [resolvable:$true] %s255_s11 }
  0x3c   :  { %v155_v10 = vld [vmem:[#allocation7] sm:$0xff]  ;;  %v156_v11 = vld [vmem:[#allocation7 + $0x8] sm:$0xff]  ;;  %v158_v13 = vld [vmem:[#allocation7 + $0x18] sm:$0xff]  ;;  %v378_v14 = vpack.c.bf16 %v66_v9, %v65_v8  ;;  %s496_s12 = scalar_lea.vmem %s256_s11, 32  ;;  %p501_p13 = scmp.lt.s32.totalorder %s256_s11, %s256_s11 }
  0x3d   :  { %373 = vmatpush3.bf16.msra.mxu0 %v372_v5  ;;  %v396_v15 = vpack.c.bf16 %v156_v11, %v155_v10  ;;  %v67_v16 = vld [vmem:[#allocation5 + $0x30] sm:$0xff]  ;;  %v68_v17 = vld [vmem:[#allocation5 + $0x38] sm:$0xff]  ;;  %v399_v18 = vpack.c.bf16 %v158_v13, %v157_v12  ;;  %v159_v19 = vld [vmem:[#allocation7 + $0x20] sm:$0xff]  ;;  %p497_p12 = scmp.ne.s32.totalorder %s256_s11, %s496_s12  ;;  %p502_p0 = scmp.lt.s32.totalorder %s496_s12, %s496_s12 }
  0x3e   :  { %374 = vmatprep.subr.bf16.mxu0 %v529_v0  ;;  %v160_v20 = vld [vmem:[#allocation7 + $0x28] sm:$0xff]  ;;  %v381_v21 = vpack.c.bf16 %v68_v17, %v67_v16  ;;  %v69_v22 = vld [vmem:[#allocation5 + $0x40] sm:$0xff]  ;;  %v161_v25 = vld [vmem:[#allocation7 + $0x30] sm:$0xff] }
  0x3f   :  { %397 = vmatpush3.bf16.msra.mxu1 %v396_v15  ;;  %v70_v23 = vld [vmem:[#allocation5 + $0x48] sm:$0xff]  ;;  %v402_v24 = vpack.c.bf16 %v160_v20, %v159_v19  ;;  %v162_v26 = vld [vmem:[#allocation7 + $0x38] sm:$0xff]  ;;  %v71_v28 = vld [vmem:[#allocation5 + $0x50] sm:$0xff]  ;;  %p503_p1 = por %p502_p0, %p501_p13 }
  0x40   :  { %398 = vmatprep.subr.bf16.mxu1 %v529_v0  ;;  %v384_v27 = vpack.c.bf16 %v70_v23, %v69_v22  ;;  %v72_v29 = vld [vmem:[#allocation5 + $0x58] sm:$0xff]  ;;  %v405_v30 = vpack.c.bf16 %v162_v26, %v161_v25  ;;  %v163_v31 = vld [vmem:[#allocation7 + $0x40] sm:$0xff]  ;;  %v164_v32 = vld [vmem:[#allocation7 + $0x48] sm:$0xff] }
  0x41   :  { %376 = vmatpush3.bf16.msra.mxu0 %v375_v7  ;;  %v387_v33 = vpack.c.bf16 %v72_v29, %v71_v28  ;;  %v73_v34 = vld [vmem:[#allocation5 + $0x60] sm:$0xff]  ;;  %v74_v35 = vld [vmem:[#allocation5 + $0x68] sm:$0xff]  ;;  %v408_v36 = vpack.c.bf16 %v164_v32, %v163_v31  ;;  %v75_v38 = vld [vmem:[#allocation5 + $0x70] sm:$0xff]  ;;  %p504_p2 = pnand %p503_p1, %p497_p12 }
  0x42   :  { %377 = vmatprep.subr.bf16.mxu0 %v529_v0  ;;  %v390_v37 = vpack.c.bf16 %v74_v35, %v73_v34  ;;  %v76_v39 = vld [vmem:[#allocation5 + $0x78] sm:$0xff]  ;;  %v165_v42 = vld [vmem:[#allocation7 + $0x50] sm:$0xff]  ;;  %v167_v45 = vld [vmem:[#allocation7 + $0x60] sm:$0xff] }
  0x43   :  { %400 = vmatpush3.bf16.msra.mxu1 %v399_v18  ;;  %v393_v40 = vpack.c.bf16 %v76_v39, %v75_v38  ;;  %v60_v41 = vld [vmem:[#allocation2] sm:$0x3]  ;;  %v168_v46 = vld [vmem:[#allocation7 + $0x68] sm:$0xff]  ;;  %v169_v48 = vld [vmem:[#allocation7 + $0x70] sm:$0xff] }
  0x44   :  { %401 = vmatprep.subr.bf16.mxu1 %v529_v0  ;;  %v166_v43 = vld [vmem:[#allocation7 + $0x58] sm:$0xff]  ;;  %v414_v47 = vpack.c.bf16 %v168_v46, %v167_v45 }
  0x45   :  { %379 = vmatpush3.bf16.msra.mxu0 %v378_v14  ;;  %v411_v44 = vpack.c.bf16 %v166_v43, %v165_v42  ;;  %v170_v49 = vld [vmem:[#allocation7 + $0x78] sm:$0xff] }
  0x46   :  { %380 = vmatprep.subr.bf16.mxu0 %v529_v0  ;;  %v417_v50 = vpack.c.bf16 %v170_v49, %v169_v48  ;;  %v265_v51 = vld [vmem:[%s644_s2] ss:$0 sm:$0xff] }
  0x47   :  { %403 = vmatpush3.bf16.msra.mxu1 %v402_v24  ;;  %v266_v56 = vld [vmem:[%s646_s4] ss:$0 sm:$0xff] }
  0x48   :  { %404 = vmatprep.subr.bf16.mxu1 %v529_v0 }
  0x49   :  { %382 = vmatpush3.bf16.msra.mxu0 %v381_v21 }
  0x4a   :  { %383 = vmatprep.subr.bf16.mxu0 %v529_v0 }
  0x4b   :  { %406 = vmatpush3.bf16.msra.mxu1 %v405_v30 }
  0x4c   :  { %407 = vmatprep.subr.bf16.mxu1 %v529_v0 }
  0x4d   :  { %385 = vmatpush3.bf16.msra.mxu0 %v384_v27 }
  0x4e   :  { %386 = vmatprep.subr.bf16.mxu0 %v529_v0 }
  0x4f   :  { %409 = vmatpush3.bf16.msra.mxu1 %v408_v36 }
  0x50   :  { %410 = vmatprep.subr.bf16.mxu1 %v529_v0 }
  0x51   :  { %388 = vmatpush3.bf16.msra.mxu0 %v387_v33 }
  0x52   :  { %389 = vmatprep.subr.bf16.mxu0 %v529_v0 }
  0x53   :  { %412 = vmatpush3.bf16.msra.mxu1 %v411_v44 }
  0x54   :  { %413 = vmatprep.subr.bf16.mxu1 %v529_v0 }
  0x55   :  { %391 = vmatpush3.bf16.msra.mxu0 %v390_v37 }
  0x56   :  { %392 = vmatprep.subr.bf16.mxu0 %v529_v0 }
  0x57   :  { %415 = vmatpush3.bf16.msra.mxu1 %v414_v47 }
  0x58   :  { %416 = vmatprep.subr.bf16.mxu1 %v529_v0 }
  0x59   :  { %394 = vmatpush3.bf16.msra.mxu0 %v393_v40 }
  0x5b   :  { %418 = vmatpush3.bf16.msra.mxu1 %v417_v50 }
  0x5c   :  { %334 = vmatmul.mubr.f32.vlgmr.msra.gmra.mrb[0].mxu0 %v60_v41 }
 0x12f   :  { %v150_v52 = vpop.f32.mrb[0].mxu0 }
 0x130   :  { %v151_v53 = vadd.f32 %v265_v51, %v150_v52  ;;  %v335_v54 = vpop.f32.mrb[1].mxu0 }
 0x132   :  { %428 = vtanh.f32 %v151_v53 }
 0x13c   :  { %v429_v55 = vpop.eup %428 }
 0x13d   :  { %369 = vmatmul.mubr.f32.vlgmr.msra.gmra.mrb[0].mxu1 %v429_v55 }
 0x210   :  { %v244_v57 = vpop.f32.mrb[0].mxu1 }
 0x211   :  { %v245_v58 = vadd.f32 %v266_v56, %v244_v57  ;;  %v370_v59 = vpop.f32.mrb[1].mxu1 }
 0x213   :  { %248 = vst [vmem:[#allocation8] sm:$0x3] %v245_v58 }
 0x214   :  { %507 = shalt.err (!%p504_p2)
}
 0x215   :  { %s508_s14 = scalar_lea.hbm %s647_s5, 32 }
 0x216   :  { %p509_p3 = scmp.ne.s32.totalorder %s647_s5, %s508_s14  ;;  %p512_p4 = scmp.lt.u32.totalorder %s508_s14, %s647_s5 }
 0x218   :  { %p514_p5 = pnand %p512_p4, %p509_p3 }
 0x21a   :  { %517 = shalt.err (!%p514_p5)
}
 0x21b   :  { %258 = dma.vmem_to_hbm [thread:$0]  %s256_s11, 32, %s647_s5, [#allocation4]  }
 0x21c   :  { %522 = dma.done.wait [#allocation4], 32  }
 0x21d   :  { %523 = vsyncadd [#allocation4], 4294967264 }
 0x21e   :  { %262 = vsyncpa [#allocation3], 1 }
 0x21f   :  { %263 = vsyncpa [#allocation6], 1 }
 0x220   :  { %264 = vsyncpa [#allocation4], 1 }

</bundles_post_ra>
